<compile_context>
chip_gen: v6e
topology: v6e:2x2x1
jax: 0.10.0
libtpu: 0.0.40
codegen_flags: <defaults>
</compile_context>

<pallas_src>
import functools

import jax
import jax.numpy as jnp
from jax import lax
from jax.experimental import pallas as pl
from jax.experimental.pallas import tpu as pltpu

_MASK_VALUE = -1.0e6   # matches d2l.sequence_mask(value=-1e6)
_PAD_VALUE = -1.0e9    # padded key columns: always excluded from the softmax


def _round_up(x, m):
    return ((x + m - 1) // m) * m


def _pad_axis(x, axis, target):
    pad = target - x.shape[axis]
    if pad <= 0:
        return x
    widths = [(0, 0)] * x.ndim
    widths[axis] = (0, pad)
    return jnp.pad(x, widths)


def _additive_attention_kernel(vl_ref, q_ref, k_ref, v_ref, wq_ref, wk_ref, wv_ref,
                               out_ref, attn_ref, scores_ref,
                               *, h_chunk, k_chunk, num_keys, mm_dtype, ew_dtype):
    """One grid step = one block of bB (padded, lane-dense) batch elements."""
    bB, Qp, _ = q_ref.shape
    _, Kp, _ = k_ref.shape
    Hp = wq_ref.shape[1]
    f32 = jnp.float32

    # ---- projections on the MXU (operands pre-cast in the wrapper, f32 accum) ----
    qh = jnp.dot(q_ref[...].reshape(bB * Qp, -1), wq_ref[...],
                 preferred_element_type=f32).reshape(bB, Qp, Hp)
    kh = jnp.dot(k_ref[...].reshape(bB * Kp, -1), wk_ref[...],
                 preferred_element_type=f32).reshape(bB, Kp, Hp)
    # One transpose per grid step so H sits on the sublane axis of `feat`;
    # the H reduction below then never touches the lane axis (no XLU hot loop).
    khT = jnp.swapaxes(kh, 1, 2).astype(ew_dtype)           # (bB, Hp, Kp)
    qh = qh.astype(ew_dtype)                                 # (bB, Qp, Hp)
    wv = wv_ref[...]                                         # (Hp, 1) float32

    # ---- additive scores, chunked over K (lanes) and H (sublanes); the (Q, K, H)
    #      intermediate never exceeds one (bB, Qp, h_chunk, k_chunk) slab ----
    for k0 in range(0, Kp, k_chunk):
        kw = min(k_chunk, Kp - k0)
        acc = jnp.zeros((bB, Qp, kw), f32)
        for h0 in range(0, Hp, h_chunk):
            hw = min(h_chunk, Hp - h0)
            feat = jnp.tanh(qh[:, :, h0:h0 + hw, None] +
                            khT[:, None, h0:h0 + hw, k0:k0 + kw])  # (bB,Qp,hw,kw) ew
            # weighted sublane reduction over H, accumulated in f32
            acc = acc + jnp.sum(feat.astype(f32) * wv[h0:h0 + hw], axis=-2)
        scores_ref[:, :, k0:k0 + kw] = acc                   # 128-aligned writes

    # ---- masked softmax over keys; mask built in-kernel from valid_lens ----
    col = lax.broadcasted_iota(jnp.int32, (1, 1, Kp), 2)
    bias = jnp.where(col < vl_ref[...], 0.0, _MASK_VALUE)    # (bB, Lq, Kp)
    bias = jnp.where(col < num_keys, bias, _PAD_VALUE)       # padded key columns
    scores = scores_ref[...] + bias                          # broadcasts over queries

    m = jnp.max(scores, axis=-1, keepdims=True)
    e = jnp.exp(scores - m)
    denom = jnp.sum(e, axis=-1, keepdims=True)
    attn = e * (1.0 / denom)        # exact divide: returned weights sum to 1
    attn_ref[...] = attn.astype(attn_ref.dtype)

    # ---- weighted sum of values (MXU). Dropout is identity in eval mode. ----
    # TODO(synk): training-mode dropout on the attention weights is not implemented.
    out = jnp.einsum("bqk,bkv->bqv", attn.astype(mm_dtype), v_ref[...],
                     preferred_element_type=f32)
    out_ref[...] = out.astype(out_ref.dtype)


@functools.partial(
    jax.jit,
    static_argnames=("matmul_dtype", "attn_dtype", "elementwise_dtype",
                     "h_chunk", "k_chunk", "block_b"))
def _additive_attention_impl(queries, keys, values, valid_lens, W_q, W_k, w_v, *,
                             matmul_dtype, attn_dtype, elementwise_dtype,
                             h_chunk, k_chunk, block_b):
    B, Q, Dq = queries.shape
    _, K, Dk = keys.shape
    _, _, Dv = values.shape
    H = W_q.shape[1]
    f32 = jnp.float32

    # Padded sizes: lane dims (K, Dv) -> multiples of 128; Q -> multiple of 8;
    # H only to a multiple of 16 (it lives on the sublane axis of `feat`).
    Qp = _round_up(Q, 8)
    Kp = _round_up(K, 128)
    Hp = _round_up(H, 16)
    Dvp = _round_up(Dv, 128)

    # Batch tile: ~128 rows per step, a divisor of B (no batch-pad copy),
    # >= 2 grid steps when possible (pipelining + megacore / 2 TCs on v7x).
    if block_b is None:
        target = max(1, 128 // Qp)
        cap = max(1, min(target, B // 2 if B >= 2 else B))
        bB = max(d for d in range(1, B + 1) if B % d == 0 and d <= cap)
    else:
        bB = max(1, min(block_b, B))
    Bp = _round_up(B, bB)
    grid = Bp // bB

    mm = matmul_dtype
    # Pre-cast the big operands to the MXU dtype (halves HBM->VMEM DMA).
    qs = _pad_axis(_pad_axis(queries.astype(mm), 1, Qp), 0, Bp)
    ks = _pad_axis(_pad_axis(keys.astype(mm), 1, Kp), 0, Bp)
    vs = _pad_axis(_pad_axis(_pad_axis(values.astype(mm), 2, Dvp), 1, Kp), 0, Bp)
    wq = _pad_axis(W_q.astype(mm), 1, Hp)
    wk = _pad_axis(W_k.astype(mm), 1, Hp)
    wv = _pad_axis(w_v.astype(f32).reshape(-1, 1), 0, Hp)         # (Hp, 1)

    # valid_lens -> tiny int32 block (Bp, Lq, 1); mask bias is built in-kernel.
    if valid_lens is None:
        vl = jnp.full((B, 1, 1), K, dtype=jnp.int32)
    else:
        vl = valid_lens.astype(jnp.int32)
        if vl.ndim == 1:
            vl = vl.reshape(B, 1, 1)
        else:
            vl = _pad_axis(vl.reshape(B, Q, 1), 1, Qp)
    vl = _pad_axis(vl, 0, Bp)
    Lq = vl.shape[1]

    hc = max(8, min(h_chunk, Hp))
    kc = max(128, (min(k_chunk, Kp) // 128) * 128)

    kernel = functools.partial(
        _additive_attention_kernel, h_chunk=hc, k_chunk=kc, num_keys=K,
        mm_dtype=mm, ew_dtype=elementwise_dtype)

    isz = lambda dt: jnp.dtype(dt).itemsize
    flops = int(2 * Bp * Qp * Dq * Hp + 2 * Bp * Kp * Dk * Hp
                + 3 * Bp * Qp * Kp * Hp + 2 * Bp * Qp * Kp * Dvp
                + 6 * Bp * Qp * Kp)
    transcendentals = int(Bp * Qp * Kp * Hp + Bp * Qp * Kp)
    bytes_accessed = int(
        (qs.size + ks.size + vs.size + wq.size + wk.size) * isz(mm)
        + wv.size * 4 + vl.size * 4
        + Bp * Qp * Dvp * isz(queries.dtype) + Bp * Qp * Kp * isz(attn_dtype))

    out_p, attn_p = pl.pallas_call(
        kernel,
        out_shape=(
            jax.ShapeDtypeStruct((Bp, Qp, Dvp), queries.dtype),
            jax.ShapeDtypeStruct((Bp, Qp, Kp), attn_dtype),
        ),
        grid_spec=pltpu.PrefetchScalarGridSpec(
            num_scalar_prefetch=0,
            grid=(grid,),
            in_specs=[
                pl.BlockSpec((bB, Lq, 1), lambda b: (b, 0, 0)),    # valid_lens
                pl.BlockSpec((bB, Qp, Dq), lambda b: (b, 0, 0)),   # queries
                pl.BlockSpec((bB, Kp, Dk), lambda b: (b, 0, 0)),   # keys
                pl.BlockSpec((bB, Kp, Dvp), lambda b: (b, 0, 0)),  # values
                pl.BlockSpec((Dq, Hp), lambda b: (0, 0)),          # W_q (resident)
                pl.BlockSpec((Dk, Hp), lambda b: (0, 0)),          # W_k (resident)
                pl.BlockSpec((Hp, 1), lambda b: (0, 0)),           # w_v (resident)
            ],
            out_specs=[
                pl.BlockSpec((bB, Qp, Dvp), lambda b: (b, 0, 0)),
                pl.BlockSpec((bB, Qp, Kp), lambda b: (b, 0, 0)),
            ],
            scratch_shapes=[pltpu.VMEM((bB, Qp, Kp), jnp.float32)],
        ),
        compiler_params=pltpu.CompilerParams(
            dimension_semantics=("parallel",),
            vmem_limit_bytes=48 * 1024 * 1024),     # safe on v7x(64M) / v6e / v5e
        cost_estimate=pl.CostEstimate(flops=flops, transcendentals=transcendentals,
                                      bytes_accessed=bytes_accessed),
    )(vl, qs, ks, vs, wq, wk, wv)

    return out_p[:B, :Q, :Dv], attn_p[:B, :Q, :K]


def additive_attention(queries, keys, values, valid_lens, W_q, W_k, w_v, *,
                       matmul_dtype=jnp.bfloat16, attn_dtype=jnp.bfloat16,
                       elementwise_dtype=None, h_chunk=64, k_chunk=128,
                       block_b=None):
    if elementwise_dtype is None:
        kind = jax.devices()[0].device_kind.lower()
        # v5e (v5 lite) has no packed-bf16 VPU/EUP path -> keep elementwise f32 there.
        is_v5e = ("v5e" in kind) or ("v5 lite" in kind) or ("v5lite" in kind)
        elementwise_dtype = jnp.float32 if is_v5e else jnp.bfloat16
    return _additive_attention_impl(
        queries, keys, values, valid_lens, W_q, W_k, w_v,
        matmul_dtype=matmul_dtype, attn_dtype=attn_dtype,
        elementwise_dtype=elementwise_dtype,
        h_chunk=h_chunk, k_chunk=k_chunk, block_b=block_b)


def _reference(queries, keys, values, valid_lens, W_q, W_k, w_v):
    """Pure-JAX reference mirroring the PyTorch forward (dropout = identity)."""
    hi = lax.Precision.HIGHEST
    qh = jnp.einsum("bqd,dh->bqh", queries, W_q, precision=hi)
    kh = jnp.einsum("bkd,dh->bkh", keys, W_k, precision=hi)
    feat = jnp.tanh(qh[:, :, None, :] + kh[:, None, :, :])      # (B, Q, K, H)
    scores = jnp.einsum("bqkh,h->bqk", feat, w_v, precision=hi)
    if valid_lens is not None:
        col = jnp.arange(scores.shape[-1])[None, None, :]
        vl = valid_lens[:, None, None] if valid_lens.ndim == 1 else valid_lens[:, :, None]
        scores = jnp.where(col < vl, scores, _MASK_VALUE)
    attn = jax.nn.softmax(scores, axis=-1)
    out = jnp.einsum("bqk,bkv->bqv", attn, values, precision=hi)
    return out, attn


if __name__ == "__main__":
    # Small shapes consistent with the module's forward.
    B, Q, K = 2, 8, 8          # batch, num queries, num key/value pairs
    Dq, Dk, H, Dv = 32, 16, 32, 64

    key = jax.random.PRNGKey(0)
    kq, kk, kv, kwq, kwk, kwv = jax.random.split(key, 6)

    queries = jax.random.normal(kq, (B, Q, Dq), dtype=jnp.float32)
    keys = jax.random.normal(kk, (B, K, Dk), dtype=jnp.float32)
    values = jax.random.normal(kv, (B, K, Dv), dtype=jnp.float32)
    valid_lens = jnp.array([3, 6], dtype=jnp.int32)

    # nn.Linear(in, out, bias=False) default init: U(-1/sqrt(in), 1/sqrt(in)),
    # stored already transposed: (in_features, out_features).
    W_q = jax.random.uniform(kwq, (Dq, H), minval=-1.0 / Dq**0.5, maxval=1.0 / Dq**0.5)
    W_k = jax.random.uniform(kwk, (Dk, H), minval=-1.0 / Dk**0.5, maxval=1.0 / Dk**0.5)
    w_v = jax.random.uniform(kwv, (H,), minval=-1.0 / H**0.5, maxval=1.0 / H**0.5)

    ref_out, ref_attn = _reference(queries, keys, values, valid_lens, W_q, W_k, w_v)

    # Default fast path: bf16 MXU + bf16 elementwise (f32 on v5e), bf16 attn output.
    out, attn_w = additive_attention(queries, keys, values, valid_lens, W_q, W_k, w_v)
    out = jax.block_until_ready(out)
    attn_w = jax.block_until_ready(attn_w)
    assert jnp.allclose(out, ref_out, atol=5e-2, rtol=5e-2), "bf16-path output mismatch"
    assert jnp.allclose(attn_w, ref_attn, atol=5e-2, rtol=5e-2), "bf16-path attn mismatch"

    # f32 path: tight numerical check against the pure-JAX reference.
    out32, attn32 = additive_attention(
        queries, keys, values, valid_lens, W_q, W_k, w_v,
        matmul_dtype=jnp.float32, attn_dtype=jnp.float32,
        elementwise_dtype=jnp.float32)
    out32 = jax.block_until_ready(out32)
    attn32 = jax.block_until_ready(attn32)
    assert jnp.allclose(out32, ref_out, atol=5e-3, rtol=5e-3), "f32-path output mismatch"
    assert jnp.allclose(attn32, ref_attn, atol=5e-3, rtol=5e-3), "f32-path attn mismatch"

    # valid_lens=None branch (plain softmax over all keys).
    ref_out_n, ref_attn_n = _reference(queries, keys, values, None, W_q, W_k, w_v)
    out_n, attn_n = additive_attention(queries, keys, values, None, W_q, W_k, w_v)
    out_n = jax.block_until_ready(out_n)
    attn_n = jax.block_until_ready(attn_n)
    assert jnp.allclose(out_n, ref_out_n, atol=5e-2, rtol=5e-2), "no-mask output mismatch"
    assert jnp.allclose(attn_n, ref_attn_n, atol=5e-2, rtol=5e-2), "no-mask attn mismatch"

    print("KERNEL_OK")
</pallas_src>

<mosaic_0001>
module attributes {stable_mosaic.version = 11 : i64} {
  func.func @_additive_attention_kernel(%arg0: i32, %arg1: memref<1x1x1xi32, #tpu.memory_space<vmem>>, %arg2: memref<1x8x32xbf16, #tpu.memory_space<vmem>>, %arg3: memref<1x128x16xbf16, #tpu.memory_space<vmem>>, %arg4: memref<1x128x128xbf16, #tpu.memory_space<vmem>>, %arg5: memref<32x32xbf16, #tpu.memory_space<vmem>>, %arg6: memref<16x32xbf16, #tpu.memory_space<vmem>>, %arg7: memref<32x1xf32, #tpu.memory_space<vmem>>, %arg8: memref<1x8x128xf32, #tpu.memory_space<vmem>>, %arg9: memref<1x8x128xbf16, #tpu.memory_space<vmem>>, %arg10: memref<1x8x128xf32, #tpu.memory_space<vmem>>) attributes {dimension_semantics = [#tpu.dimension_semantics<parallel>], iteration_bounds = array<i64: 2>, scalar_prefetch = 0 : i64, scratch_operands = 1 : i64, tpu.core_type = #tpu.core_type<tc>, window_params = [{transform_indices = @transform_0, window_bounds = array<i64: 1, 1, 1>}, {transform_indices = @transform_1, window_bounds = array<i64: 1, 8, 32>}, {transform_indices = @transform_2, window_bounds = array<i64: 1, 128, 16>}, {transform_indices = @transform_3, window_bounds = array<i64: 1, 128, 128>}, {pipeline_mode = #tpu.pipeline_mode<synchronous>, transform_indices = @transform_4, window_bounds = array<i64: 32, 32>}, {pipeline_mode = #tpu.pipeline_mode<synchronous>, transform_indices = @transform_5, window_bounds = array<i64: 16, 32>}, {pipeline_mode = #tpu.pipeline_mode<synchronous>, transform_indices = @transform_6, window_bounds = array<i64: 32, 1>}, {transform_indices = @transform_7, window_bounds = array<i64: 1, 8, 128>}, {transform_indices = @transform_8, window_bounds = array<i64: 1, 8, 128>}]} {
    %c0 = arith.constant 0 : index
    %c0_0 = arith.constant 0 : index
    %c0_1 = arith.constant 0 : index
    %0 = vector.load %arg2[%c0, %c0_0, %c0_1] : memref<1x8x32xbf16, #tpu.memory_space<vmem>>, vector<1x8x32xbf16>
    %1 = vector.shape_cast %0 : vector<1x8x32xbf16> to vector<8x32xbf16>
    %c0_2 = arith.constant 0 : index
    %c0_3 = arith.constant 0 : index
    %2 = vector.load %arg5[%c0_2, %c0_3] : memref<32x32xbf16, #tpu.memory_space<vmem>>, vector<32x32xbf16>
    %cst = arith.constant dense<0.000000e+00> : vector<8x32xf32>
    %3 = tpu.matmul %1, %2, %cst {dimension_numbers = #tpu.dot_dimension_numbers<[1], [0], [0], [1], [0, 0, 1, 1], [], []>} : vector<8x32xbf16>, vector<32x32xbf16>, vector<8x32xf32> -> vector<8x32xf32>
    %4 = vector.shape_cast %3 : vector<8x32xf32> to vector<1x8x32xf32>
    %c0_4 = arith.constant 0 : index
    %c0_5 = arith.constant 0 : index
    %c0_6 = arith.constant 0 : index
    %5 = vector.load %arg3[%c0_4, %c0_5, %c0_6] : memref<1x128x16xbf16, #tpu.memory_space<vmem>>, vector<1x128x16xbf16>
    %6 = vector.shape_cast %5 : vector<1x128x16xbf16> to vector<128x16xbf16>
    %c0_7 = arith.constant 0 : index
    %c0_8 = arith.constant 0 : index
    %7 = vector.load %arg6[%c0_7, %c0_8] : memref<16x32xbf16, #tpu.memory_space<vmem>>, vector<16x32xbf16>
    %cst_9 = arith.constant dense<0.000000e+00> : vector<128x32xf32>
    %8 = tpu.matmul %6, %7, %cst_9 {dimension_numbers = #tpu.dot_dimension_numbers<[1], [0], [0], [1], [0, 0, 1, 1], [], []>} : vector<128x16xbf16>, vector<16x32xbf16>, vector<128x32xf32> -> vector<128x32xf32>
    %9 = vector.shape_cast %8 : vector<128x32xf32> to vector<1x128x32xf32>
    %10 = tpu.transpose %9, [0, 2, 1] : vector<1x128x32xf32> -> vector<1x32x128xf32>
    %11 = arith.truncf %10 : vector<1x32x128xf32> to vector<1x32x128xbf16>
    %12 = arith.truncf %4 : vector<1x8x32xf32> to vector<1x8x32xbf16>
    %c0_10 = arith.constant 0 : index
    %c0_11 = arith.constant 0 : index
    %13 = vector.load %arg7[%c0_10, %c0_11] : memref<32x1xf32, #tpu.memory_space<vmem>>, vector<32x1xf32>
    %cst_12 = arith.constant 0.000000e+00 : f32
    %14 = vector.broadcast %cst_12 : f32 to vector<1x8x128xf32>
    %15 = vector.shape_cast %12 : vector<1x8x32xbf16> to vector<1x8x32x1xbf16>
    %16 = vector.shape_cast %11 : vector<1x32x128xbf16> to vector<1x1x32x128xbf16>
    %17 = vector.broadcast %15 : vector<1x8x32x1xbf16> to vector<1x8x32x128xbf16>
    %18 = vector.broadcast %16 : vector<1x1x32x128xbf16> to vector<1x8x32x128xbf16>
    %19 = arith.addf %17, %18 : vector<1x8x32x128xbf16>
    %20 = math.tanh %19 : vector<1x8x32x128xbf16>
    %21 = arith.extf %20 : vector<1x8x32x128xbf16> to vector<1x8x32x128xf32>
    %22 = vector.shape_cast %13 : vector<32x1xf32> to vector<1x1x32x1xf32>
    %23 = vector.broadcast %22 : vector<1x1x32x1xf32> to vector<1x8x32x128xf32>
    %24 = arith.mulf %21, %23 : vector<1x8x32x128xf32>
    %cst_13 = arith.constant dense<0.000000e+00> : vector<1x8x128xf32>
    %25 = vector.multi_reduction <add>, %24, %cst_13 [2] : vector<1x8x32x128xf32> to vector<1x8x128xf32>
    %26 = arith.addf %14, %25 : vector<1x8x128xf32>
    %c0_14 = arith.constant 0 : index
    %c0_15 = arith.constant 0 : index
    %c0_16 = arith.constant 0 : index
    %27 = vector.load %arg10[%c0_14, %c0_15, %c0_16] : memref<1x8x128xf32, #tpu.memory_space<vmem>>, vector<1x8x128xf32>
    tpu.vector_store %arg10[%c0_14, %c0_15, %c0_16], %26 {strides = array<i32>} : memref<1x8x128xf32, #tpu.memory_space<vmem>>, vector<1x8x128xf32>,
    %28 = tpu.iota {dimensions = array<i32: 2>} : vector<1x1x128xi32>
    %c0_17 = arith.constant 0 : index
    %c0_18 = arith.constant 0 : index
    %c0_19 = arith.constant 0 : index
    %29 = vector.load %arg1[%c0_17, %c0_18, %c0_19] : memref<1x1x1xi32, #tpu.memory_space<vmem>>, vector<1x1x1xi32>
    %30 = vector.broadcast %29 : vector<1x1x1xi32> to vector<1x1x128xi32>
    %31 = arith.cmpi slt, %28, %30 : vector<1x1x128xi32>
    %cst_20 = arith.constant 0.000000e+00 : f32
    %cst_21 = arith.constant -1.000000e+06 : f32
    %32 = vector.broadcast %cst_20 : f32 to vector<1x1x128xf32>
    %33 = vector.broadcast %cst_21 : f32 to vector<1x1x128xf32>
    %34 = arith.select %31, %32, %33 : vector<1x1x128xi1>, vector<1x1x128xf32>
    %c8_i32 = arith.constant 8 : i32
    %35 = vector.broadcast %c8_i32 : i32 to vector<1x1x128xi32>
    %36 = arith.cmpi slt, %28, %35 : vector<1x1x128xi32>
    %cst_22 = arith.constant -1.000000e+09 : f32
    %37 = vector.broadcast %cst_22 : f32 to vector<1x1x128xf32>
    %38 = arith.select %36, %34, %37 : vector<1x1x128xi1>, vector<1x1x128xf32>
    %c0_23 = arith.constant 0 : index
    %c0_24 = arith.constant 0 : index
    %c0_25 = arith.constant 0 : index
    %39 = vector.load %arg10[%c0_23, %c0_24, %c0_25] : memref<1x8x128xf32, #tpu.memory_space<vmem>>, vector<1x8x128xf32>
    %40 = vector.broadcast %38 : vector<1x1x128xf32> to vector<1x8x128xf32>
    %41 = arith.addf %39, %40 : vector<1x8x128xf32>
    %cst_26 = arith.constant dense<0xFF800000> : vector<1x8xf32>
    %42 = vector.multi_reduction <maximumf>, %41, %cst_26 [2] : vector<1x8x128xf32> to vector<1x8xf32>
    %43 = vector.shape_cast %42 : vector<1x8xf32> to vector<1x8x1xf32>
    %44 = vector.broadcast %43 : vector<1x8x1xf32> to vector<1x8x128xf32>
    %45 = arith.subf %41, %44 : vector<1x8x128xf32>
    %46 = math.exp %45 : vector<1x8x128xf32>
    %cst_27 = arith.constant dense<0.000000e+00> : vector<1x8xf32>
    %47 = vector.multi_reduction <add>, %46, %cst_27 [2] : vector<1x8x128xf32> to vector<1x8xf32>
    %48 = vector.shape_cast %47 : vector<1x8xf32> to vector<1x8x1xf32>
    %cst_28 = arith.constant 1.000000e+00 : f32
    %49 = vector.broadcast %cst_28 : f32 to vector<1x8x1xf32>
    %50 = arith.divf %49, %48 : vector<1x8x1xf32>
    %51 = vector.broadcast %50 : vector<1x8x1xf32> to vector<1x8x128xf32>
    %52 = arith.mulf %46, %51 : vector<1x8x128xf32>
    %53 = arith.truncf %52 : vector<1x8x128xf32> to vector<1x8x128xbf16>
    %c0_29 = arith.constant 0 : index
    %c0_30 = arith.constant 0 : index
    %c0_31 = arith.constant 0 : index
    %54 = vector.load %arg9[%c0_29, %c0_30, %c0_31] : memref<1x8x128xbf16, #tpu.memory_space<vmem>>, vector<1x8x128xbf16>
    tpu.vector_store %arg9[%c0_29, %c0_30, %c0_31], %53 {strides = array<i32>} : memref<1x8x128xbf16, #tpu.memory_space<vmem>>, vector<1x8x128xbf16>,
    %55 = arith.truncf %52 : vector<1x8x128xf32> to vector<1x8x128xbf16>
    %c0_32 = arith.constant 0 : index
    %c0_33 = arith.constant 0 : index
    %c0_34 = arith.constant 0 : index
    %56 = vector.load %arg4[%c0_32, %c0_33, %c0_34] : memref<1x128x128xbf16, #tpu.memory_space<vmem>>, vector<1x128x128xbf16>
    "tpu.trace_start"() <{level = 10 : i32, message = "bqk,bkv->bqv"}> : () -> ()
    %cst_35 = arith.constant dense<0.000000e+00> : vector<1x8x128xf32>
    %57 = tpu.matmul %55, %56, %cst_35 {dimension_numbers = #tpu.dot_dimension_numbers<[2], [1], [1], [2], [0, 0, 0, 1, 1, 2], [0], [0]>} : vector<1x8x128xbf16>, vector<1x128x128xbf16>, vector<1x8x128xf32> -> vector<1x8x128xf32>
    "tpu.trace_stop"() : () -> ()
    %c0_36 = arith.constant 0 : index
    %c0_37 = arith.constant 0 : index
    %c0_38 = arith.constant 0 : index
    %58 = vector.load %arg8[%c0_36, %c0_37, %c0_38] : memref<1x8x128xf32, #tpu.memory_space<vmem>>, vector<1x8x128xf32>
    tpu.vector_store %arg8[%c0_36, %c0_37, %c0_38], %57 {strides = array<i32>} : memref<1x8x128xf32, #tpu.memory_space<vmem>>, vector<1x8x128xf32>,
    return
  }
  func.func @transform_0(%arg0: i32) -> (i32, i32, i32) {
    %c0_i32 = arith.constant 0 : i32
    %c0_i32_0 = arith.constant 0 : i32
    %c0_i32_1 = arith.constant 0 : i32
    return %arg0, %c0_i32, %c0_i32_0 : i32, i32, i32
  }
  func.func @transform_1(%arg0: i32) -> (i32, i32, i32) {
    %c0_i32 = arith.constant 0 : i32
    %c0_i32_0 = arith.constant 0 : i32
    %c0_i32_1 = arith.constant 0 : i32
    return %arg0, %c0_i32, %c0_i32_0 : i32, i32, i32
  }
  func.func @transform_2(%arg0: i32) -> (i32, i32, i32) {
    %c0_i32 = arith.constant 0 : i32
    %c0_i32_0 = arith.constant 0 : i32
    %c0_i32_1 = arith.constant 0 : i32
    return %arg0, %c0_i32, %c0_i32_0 : i32, i32, i32
  }
  func.func @transform_3(%arg0: i32) -> (i32, i32, i32) {
    %c0_i32 = arith.constant 0 : i32
    %c0_i32_0 = arith.constant 0 : i32
    %c0_i32_1 = arith.constant 0 : i32
    return %arg0, %c0_i32, %c0_i32_0 : i32, i32, i32
  }
  func.func @transform_4(%arg0: i32) -> (i32, i32) {
    %c0_i32 = arith.constant 0 : i32
    %c0_i32_0 = arith.constant 0 : i32
    %c0_i32_1 = arith.constant 0 : i32
    return %c0_i32, %c0_i32_0 : i32, i32
  }
  func.func @transform_5(%arg0: i32) -> (i32, i32) {
    %c0_i32 = arith.constant 0 : i32
    %c0_i32_0 = arith.constant 0 : i32
    %c0_i32_1 = arith.constant 0 : i32
    return %c0_i32, %c0_i32_0 : i32, i32
  }
  func.func @transform_6(%arg0: i32) -> (i32, i32) {
    %c0_i32 = arith.constant 0 : i32
    %c0_i32_0 = arith.constant 0 : i32
    %c0_i32_1 = arith.constant 0 : i32
    return %c0_i32, %c0_i32_0 : i32, i32
  }
  func.func @transform_7(%arg0: i32) -> (i32, i32, i32) {
    %c0_i32 = arith.constant 0 : i32
    %c0_i32_0 = arith.constant 0 : i32
    %c0_i32_1 = arith.constant 0 : i32
    return %arg0, %c0_i32, %c0_i32_0 : i32, i32, i32
  }
  func.func @transform_8(%arg0: i32) -> (i32, i32, i32) {
    %c0_i32 = arith.constant 0 : i32
    %c0_i32_0 = arith.constant 0 : i32
    %c0_i32_1 = arith.constant 0 : i32
    return %arg0, %c0_i32, %c0_i32_0 : i32, i32, i32
  }
}

</mosaic_0001>

<bundles_post_ra>
// kernel: _additive_attention_impl.1
= control target key start
LH: loop header
LB: loop body
LE: loop exit
PB: predicated region body
PF: predicated region fallthrough
CT: control target
= control target key end

     0   :  { %s1865_s0 = inlined_call_operand.vmem [shape: s32[2,1,1], index: 0, kind: input, shape index: {}]   ;;  %s1866_s1 = inlined_call_operand.vmem [shape: bf16[2,8,32], index: 1, kind: input, shape index: {}]   ;;  %s1867_s2 = inlined_call_operand.vmem [shape: bf16[2,128,16], index: 2, kind: input, shape index: {}]   ;;  %s1868_s3 = inlined_call_operand.vmem [shape: bf16[2,128,128], index: 3, kind: input, shape index: {}]   ;;  %s1869_s4 = inlined_call_operand.vmem [shape: bf16[32,32], index: 4, kind: input, shape index: {}]   ;;  %s1870_s5 = inlined_call_operand.vmem [shape: bf16[16,32], index: 5, kind: input, shape index: {}]   ;;  %s1871_s6 = inlined_call_operand.vmem [shape: f32[32,1], index: 6, kind: input, shape index: {}]   ;;  %s1872_s7 = inlined_call_operand.hbm [shape: f32[2,8,128], index: 7, kind: output, shape index: {0}]   ;;  %s1873_s8 = inlined_call_operand.hbm [shape: bf16[2,8,128], index: 8, kind: output, shape index: {1}]  }
   0x1   :  { %1874 = sst [smem:[#allocation9_spill]] %s1865_s0 }
   0x2   :  { %14 = vsyncpa [#allocation4], 0 }
   0x3   :  { %16 = vsyncpa [#allocation4 + $0x1], 0 }
   0x4   :  { %17 = vsyncpa [#allocation6], 0 }
   0x5   :  { %19 = vsyncpa [#allocation6 + $0x1], 0  ;;  %s1618_s27 = smov 0   ;;  %s1620_s28 = smov 0  }
   0x6   :  { %s1622_s29 = smov 0   ;;  %s1624_s30 = smov 0  }
   0x7 LB: > { %s1639_s9 = sadd.s32 4294967295, %s1565_s30   ;;  %s1256_s10 = sadd.s32 4294967294, %s1565_s30   ;;  %s1565_s30 = sphi %s1624_s30, %s1881_s30   ;;  %s1561_s29 = sphi %s1622_s29, %s1880_s29   ;;  %s1557_s28 = sphi %s1620_s28, %s1879_s28   ;;  %s1553_s27 = sphi %s1618_s27, %s1878_s27  }
   0x8   : > { %s1643_s11 = sadd.s32 1, %s1565_s30   ;;  %s199_s12 = sadd.s32 1, %s1561_s29 }
   0x9   : > { %s196_s13 = ssub.s32 %s1565_s30, %s1643_s11  ;;  %p209_p0 = scmp.ne.s32.totalorder %s1561_s29, %s1557_s28 }
   0xa   : > { %p197_p1 = scmp.eq.s32.totalorder %s196_s13, 0  ;;  %p210_p2 = scmp.eq.s32.totalorder %s1639_s9, 1 }
   0xb   : > { %p215_p3 = scmp.ne.s32.totalorder %s1557_s28, %s1553_s27  ;;  %p216_p4 = scmp.eq.s32.totalorder %s1256_s10, 1 }
   0xc   : > { %s1654_s14 = scalar_select %p197_p1, %s1561_s29, %s199_s12  }
   0xd   : > { %p1656_p5 = por %p210_p2, %p209_p0  ;;  %p1660_p6 = por %p216_p4, %p215_p3 }
   0xe   : > { %p1259_p7 = scmp.ge.s32.totalorder %s1565_s30, 1  ;;  %p298_p8 = scmp.lt.s32.totalorder %s1565_s30, 3 }
  0x10   : > { %p299_p9 = pnand %p1259_p7, %p298_p8 }
  0x11   : > { %p349_p10 = scmp.lt.s32.totalorder (!%p299_p9), %s1639_s9, 1  ;;  %s1877_s0 = sld [smem:[#allocation9_spill]] (!%p299_p9) }
  0x12   : > { %302 = sbr.rel (%p299_p9) target bundleno = 1022 (0x3fe), region = 48 }
  0x17   : > { %v1420_v0 = vld [vmem:[%s1869_s4 + $0x8] sm:$0xff]   ;;  %v1567_v1 = vmov 0.0   ;;  %v1421_v2 = vld [vmem:[%s1869_s4] sm:$0xff]   ;;  %vm1568_vm0 = vmmov 0   ;;  %s1681_s23 = scalar_select %p349_p10, %s1639_s9, 1  ;;  %vm384_vm1 = vcmask 261120   ;;  %v656_v14 = vlaneseq }
  0x18   : > { %1324 = vmatprep.subr.bf16.mxu0 %v1567_v1  ;;  %1328 = vmatprep.mubr.msk.bf16.mxu0 %vm1568_vm0, %v1567_v1  ;;  %v1422_v3 = vld [vmem:[%s1870_s5] sm:$0xff]   ;;  %vm492_vm2 = vcmask 130048   ;;  %v1569_v13 = vmov 0   ;;  %v650_v35 = vld [vmem:[%s1871_s6 + $0x8] sm:$0xff]  ;;  %v651_v36 = vld [vmem:[%s1871_s6 + $0x10] sm:$0xff]  ;;  %vm951_vm3 = vcmask 1041409  }
  0x19   : > { %1325 = vmatpush3.bf16.msra.mxu0 %v1420_v0  ;;  %1332 = vmatprep.subr.bf16.mxu1 %v1422_v3  ;;  %s1262_s24 = sshll.u32 %s1681_s23, 2  ;;  %s1301_s25 = sshll.u32 %s1681_s23, 6  ;;  %v657_v15 = vshrl.u32 %v656_v14, 7  ;;  %v649_v37 = vld [vmem:[%s1871_s6] sm:$0xff]  ;;  %v652_v39 = vld [vmem:[%s1871_s6 + $0x18] sm:$0xff]  ;;  %vm953_vm4 = vcmask 1042434  }
  0x1a   : > { %1326 = vmatprep.subr.bf16.mxu0 %v1567_v1  ;;  %1333 = vmatpush3.bf16.msra.mxu1 %v1422_v3  ;;  %s355_s12 = scalar_lea.vmem %s1866_s1, %s1262_s24  ;;  %s360_s18 = scalar_lea.vmem %s1867_s2, %s1301_s25  ;;  %vm955_vm5 = vcmask 1043459   ;;  %vm957_vm6 = vcmask 1044484   ;;  %vm959_vm8 = vcmask 1045509   ;;  %vm961_vm9 = vcmask 1046534  }
  0x1b   : > { %1350 = vmatprep.subr.bf16.mxu1 %v1567_v1  ;;  %v367_v4 = vld [vmem:[%s355_s12] sm:$0xf]  ;;  %v1424_v6 = vld [vmem:[%s360_s18 + $0x8] sm:$0xff]   ;;  %v1425_v7 = vld [vmem:[%s360_s18 + $0x10] sm:$0xff]   ;;  %s1698_s21 = scalar_lea.vmem %s1868_s3, %s1301_s25  ;;  %1419 = vset.pattern.permute.xlu1 %v1569_v13  ;;  %v683_v18 = vsub.s32 1, %v657_v15  ;;  %v1708_v19 = vsub.s32 0, %v657_v15  ;;  %s351_s20 = scalar_lea.vmem %s1877_s0, %s1681_s23 }
  0x1c   : > { %v1423_v5 = vld [vmem:[%s360_s18] sm:$0xff]   ;;  %v1426_v8 = vld [vmem:[%s360_s18 + $0x18] sm:$0xff]   ;;  %v1428_v10 = vld [vmem:[%s360_s18 + $0x28] sm:$0xff]   ;;  %1418 = vset.pattern.permute.xlu0 %v1569_v13  ;;  %v705_v27 = vsub.s32 2, %v657_v15  ;;  %v727_v30 = vsub.s32 3, %v657_v15  ;;  %vm963_vm10 = vcmask 1047559  }
  0x1d   : > { %1327 = vmatpush3.bf16.msra.mxu0 %v1421_v2  ;;  %1334 = vmatprep.mubr.msk.bf16.mxu1 %vm492_vm2, %v1423_v5  ;;  %v1427_v9 = vld [vmem:[%s360_s18 + $0x20] sm:$0xff]   ;;  %v1429_v11 = vld [vmem:[%s360_s18 + $0x30] sm:$0xff]   ;;  %v1430_v12 = vld [vmem:[%s360_s18 + $0x38] sm:$0xff]   ;;  %s1798_s23 = sand.u32 1, %s1557_s28   ;;  %s1298_s25 = sshll.u32 %s1639_s9, 6 }
  0x1e   : > { %1335 = vmatmul.mubr.msk.bf16.vlgmr.msra.gmra.mxu1 %vm492_vm2, %v1424_v6  ;;  %v969_v40 = vld [vmem:[%s351_s20] sm:$0x1]  ;;  %s1261_s22 = sshll.u32 %s1798_s23, 2  ;;  %s1130_s12 = scalar_lea.hbm %s1873_s8, %s1298_s25 }
  0x1f   : > { %1338 = vmatprep.mubr.msk.bf16.mxu1 %vm492_vm2, %v1425_v7  ;;  %s348_s24 = scalar_lea.vmem [#allocation5], %s1261_s22  ;;  %s1106_s13 = scalar_lea.sflag [#allocation6], %s1798_s23 }
  0x20   : > { %1329 = vmatmul.mubr.msk.bf16.vlgmr.msra.gmra.mxu0 %vm384_vm1, %v367_v4  ;;  %s1132_s26 = sshll.u32 %s348_s24, 4  ;;  %s1571_s18 = smov [#allocation5]   ;;  %s1133_s26 = int_to_ptr.vmem [resolvable:$true] %s1132_s26 }
  0x21   : > { %s1475_s17 = scalar_lea.vmem %s1133_s26, 64  ;;  %s1479_s19 = sshll.u32 %s1571_s18, 4  ;;  %s1480_s19 = int_to_ptr.vmem [resolvable:$false] %s1479_s19 }
  0x22   : > { %p1476_p11 = scmp.ne.s32.totalorder %s1133_s26, %s1475_s17  ;;  %s1481_s20 = scalar_lea.vmem %s1480_s19, 128 }
  0x23   : > { %p1482_p0 = scmp.lt.s32.totalorder %s1133_s26, %s1480_s19  ;;  %p1483_p1 = scmp.lt.s32.totalorder %s1481_s20, %s1475_s17 }
  0x24   : > { %p1477_p12 = pnand %p1476_p11, %p1656_p5 }
  0x25   : > { %p1484_p2 = por %p1483_p1, %p1482_p0 }
  0x26   : > { %1339 = vmatmul.mubr.msk.bf16.gmra.mxu1 %vm492_vm2, %v1426_v8  ;;  %p1478_p13 = pneg %p1477_p12 }
  0x27   : > { %1342 = vmatprep.mubr.msk.bf16.mxu1 %vm492_vm2, %v1427_v9 }
  0x28   : > { %p1485_p3 = pnand %p1484_p2, %p1478_p13 }
  0x2e   : > { %1343 = vmatmul.mubr.msk.bf16.gmra.mxu1 %vm492_vm2, %v1428_v10 }
  0x2f   : > { %1346 = vmatprep.mubr.msk.bf16.mxu1 %vm492_vm2, %v1429_v11 }
  0x36   : > { %1347 = vmatmul.mubr.msk.bf16.gmra.mxu1 %vm492_vm2, %v1430_v12 }
  0x37   : > { %1366 = vmatprep.mubr.msk.bf16.mxu1 %vm1568_vm0, %v1567_v1 }
  0xde   : > { %v1336_v41 = vpop.f32.mrf.mxu1 }
  0xe0   : > { %v422_v16 = vpop.f32.mrf.mxu0  ;;  %v551_v42 = vpop.f32.mrf.mxu1 }
  0xe1   : > { %v648_v17 = vpack.c.bf16 %v422_v16, %v422_v16 }
  0xe2   : > { %v1330_v20 = vpop.f32.mrf.mxu0  ;;  %v1337_v43 = vpop.f32.mrf.mxu1 }
  0xe3   : > { %v654_v21 = vpack.i.b16 %v648_v17, %v648_v17  ;;  %v667_v26 = vshrl.u32 %v648_v17, 16 }
  0xe4   : > { %v425_v22 = vpop.f32.mrf.mxu0  ;;  %v554_v44 = vpop.f32.mrf.mxu1 }
  0xe5   : > { %v684_v23 = vrot.slane %v654_v21, %v683_v18  ;;  %v659_v24 = vrot.slane %v654_v21, %v1708_v19  ;;  %v668_v28 = vpack.i.b16 %v667_v26, %v667_v26  ;;  %v706_v29 = vrot.slane %v654_v21, %v705_v27 }
  0xe6   : > { %v1331_v25 = vpop.f32.mrf.mxu0  ;;  %v728_v31 = vrot.slane %v654_v21, %v727_v30  ;;  %v1340_v45 = vpop.f32.mrf.mxu1 }
  0xe7   : > { %686 = vbcast.lane.c.b16.xlu1 %v684_v23, 256  ;;  %661 = vbcast.lane.c.b16.xlu0 %v659_v24, 256  ;;  %v673_v32 = vrot.slane %v668_v28, %v1708_v19  ;;  %v695_v33 = vrot.slane %v668_v28, %v683_v18  ;;  %v717_v34 = vrot.slane %v668_v28, %v705_v27 }
  0xe8   : > { %v739_v38 = vrot.slane %v668_v28, %v727_v30  ;;  %v567_v46 = vpop.f32.mrf.mxu1 }
  0xea   : > { %v1341_v47 = vpop.f32.mrf.mxu1 }
  0xeb   : > { %665 = vbcast.lane.c.b16.xlu1 %v659_v24, 272  ;;  %690 = vbcast.lane.c.b16.xlu0 %v684_v23, 272 }
  0xec   : > { %v570_v48 = vpop.f32.mrf.mxu1 }
  0xee   : > { %v1344_v49 = vpop.f32.mrf.mxu1 }
  0xef   : > { %708 = vbcast.lane.c.b16.xlu1 %v706_v29, 256  ;;  %712 = vbcast.lane.c.b16.xlu0 %v706_v29, 272 }
  0xf0   : > { %v583_v50 = vpop.f32.mrf.mxu1 }
  0xf2   : > { %v1345_v51 = vpop.f32.mrf.mxu1 }
  0xf3   : > { %730 = vbcast.lane.c.b16.xlu1 %v728_v31, 256  ;;  %675 = vbcast.lane.c.b16.xlu0 %v673_v32, 256 }
  0xf4   : > { %v586_v52 = vpop.f32.mrf.mxu1 }
  0xf6   : > { %v1348_v53 = vpop.f32.mrf.mxu1 }
  0xf7   : > { %697 = vbcast.lane.c.b16.xlu1 %v695_v33, 256  ;;  %679 = vbcast.lane.c.b16.xlu0 %v673_v32, 272 }
  0xf8   : > { %v599_v54 = vpop.f32.mrf.mxu1 }
  0xfa   : > { %v1349_v55 = vpop.f32.mrf.mxu1 }
  0xfb   : > { %719 = vbcast.lane.c.b16.xlu1 %v717_v34, 256  ;;  %701 = vbcast.lane.c.b16.xlu0 %v695_v33, 272 }
  0xfc   : > { %v602_v56 = vpop.f32.mrf.mxu1 }
  0xff   : > { %818 = vperm.xlu1 %1419, %v650_v35   ;;  %723 = vbcast.lane.c.b16.xlu0 %v717_v34, 272 }
 0x103   : > { %823 = vperm.xlu1 %1419, %v651_v36   ;;  %734 = vbcast.lane.c.b16.xlu0 %v728_v31, 272 }
 0x107   : > { %741 = vbcast.lane.c.b16.xlu1 %v739_v38, 256  ;;  %813 = vperm.xlu0 %1418, %v649_v37  }
 0x10b   : > { %745 = vbcast.lane.c.b16.xlu1 %v739_v38, 272  ;;  %828 = vperm.xlu0 %1418, %v652_v39  }
 0x10f   : > { %971 = vperm.xlu0 %1418, %v969_v40  }
 0x134   : > { %614 = vxpose.xlu1.b32.start [1/16] (narrow) %v551_v42, 32 }
 0x138   : > { %615 = vxpose.xlu1.b32.cont [2/16] (narrow) %v554_v44, 32 }
 0x13c   : > { %616 = vxpose.xlu1.b32.cont [3/16] (narrow) %v1336_v41, 32 }
 0x140   : > { %617 = vxpose.xlu1.b32.cont [4/16] (narrow) %v1337_v43, 32 }
 0x144   : > { %618 = vxpose.xlu1.b32.cont [5/16] (narrow) %v567_v46, 32 }
 0x148   : > { %619 = vxpose.xlu1.b32.cont [6/16] (narrow) %v570_v48, 32 }
 0x14c   : > { %620 = vxpose.xlu1.b32.cont [7/16] (narrow) %v1340_v45, 32 }
 0x150   : > { %621 = vxpose.xlu1.b32.cont [8/16] (narrow) %v1341_v47, 32 }
 0x154   : > { %622 = vxpose.xlu1.b32.cont [9/16] (narrow) %v583_v50, 32 }
 0x158   : > { %623 = vxpose.xlu1.b32.cont [10/16] (narrow) %v586_v52, 32 }
 0x159   : > { %v687_v57 = vpop.permute.xlu1 %686  ;;  %v662_v63 = vpop.permute.xlu0 %661 }
 0x15c   : > { %624 = vxpose.xlu1.b32.cont [11/16] (narrow) %v1344_v49, 32 }
 0x15d   : > { %v666_v58 = vpop.permute.xlu1 %665  ;;  %v691_v2 = vpop.permute.xlu0 %690 }
 0x160   : > { %625 = vxpose.xlu1.b32.cont [12/16] (narrow) %v1345_v51, 32 }
 0x161   : > { %v709_v59 = vpop.permute.xlu1 %708  ;;  %v713_v4 = vpop.permute.xlu0 %712 }
 0x164   : > { %626 = vxpose.xlu1.b32.cont [13/16] (narrow) %v599_v54, 32 }
 0x165   : > { %v731_v60 = vpop.permute.xlu1 %730  ;;  %v676_v6 = vpop.permute.xlu0 %675 }
 0x168   : > { %627 = vxpose.xlu1.b32.cont [14/16] (narrow) %v602_v56, 32 }
 0x169   : > { %v698_v61 = vpop.permute.xlu1 %697  ;;  %v680_v8 = vpop.permute.xlu0 %679 }
 0x16c   : > { %628 = vxpose.xlu1.b32.cont [15/16] (narrow) %v1348_v53, 32 }
 0x16d   : > { %v720_v62 = vpop.permute.xlu1 %719  ;;  %v702_v12 = vpop.permute.xlu0 %701 }
 0x170   : > { %629 = vxpose.xlu1.b32.end [16/16] (narrow) %v1349_v55, 32 }
 0x171   : > { %v724_v23 = vpop.permute.xlu0 %723 }
 0x175   : > { %v735_v32 = vpop.permute.xlu0 %734 }
 0x17a   : > { %v1728_v0 = vpop.permute.xlu1 %818 }
 0x17e   : > { %v1730_v3 = vpop.permute.xlu1 %823 }
 0x182   : > { %v742_v5 = vpop.permute.xlu1 %741  ;;  %v1732_v43 = vpop.permute.xlu0 %813 }
 0x186   : > { %v746_v7 = vpop.permute.xlu1 %745 }
 0x1b0   : > { %v630_v9 = vpop.trf.xlu1 }
 0x1b4   : > { %v631_v10 = vpop.trf.xlu1 }
 0x1b5   : > { %v646_v11 = vpack.c.bf16 %v631_v10, %v630_v9 }
 0x1b7   : > { %v747_v13 = vadd.bf16 %v662_v63, %v646_v11  ;;  %v749_v15 = vadd.bf16 %v676_v6, %v646_v11  ;;  %v751_v16 = vadd.bf16 %v687_v57, %v646_v11  ;;  %v753_v17 = vadd.bf16 %v698_v61, %v646_v11 }
 0x1b8   : > { %v632_v18 = vpop.trf.xlu1  ;;  %v755_v20 = vadd.bf16 %v709_v59, %v646_v11  ;;  %v757_v21 = vadd.bf16 %v720_v62, %v646_v11  ;;  %v759_v22 = vadd.bf16 %v731_v60, %v646_v11  ;;  %v761_v24 = vadd.bf16 %v742_v5, %v646_v11 }
 0x1b9   : > { %1439 = vtanh.bf16 %v747_v13 }
 0x1ba   : > { %1441 = vtanh.bf16 %v749_v15 }
 0x1bb   : > { %1443 = vtanh.bf16 %v751_v16 }
 0x1bc   : > { %1445 = vtanh.bf16 %v753_v17  ;;  %v633_v25 = vpop.trf.xlu1 }
 0x1bd   : > { %1447 = vtanh.bf16 %v755_v20  ;;  %v647_v26 = vpack.c.bf16 %v633_v25, %v632_v18 }
 0x1be   : > { %1449 = vtanh.bf16 %v757_v21 }
 0x1bf   : > { %1451 = vtanh.bf16 %v759_v22  ;;  %v748_v27 = vadd.bf16 %v666_v58, %v647_v26  ;;  %v750_v28 = vadd.bf16 %v680_v8, %v647_v26  ;;  %v752_v29 = vadd.bf16 %v691_v2, %v647_v26 }
 0x1c0   : > { %1453 = vtanh.bf16 %v761_v24  ;;  %v754_v30 = vadd.bf16 %v702_v12, %v647_v26  ;;  %v756_v31 = vadd.bf16 %v713_v4, %v647_v26  ;;  %v758_v33 = vadd.bf16 %v724_v23, %v647_v26  ;;  %v829_v23 = vpop.permute.xlu0 %828 }
 0x1c1   : > { %1455 = vtanh.bf16 %v748_v27  ;;  %v760_v34 = vadd.bf16 %v735_v32, %v647_v26  ;;  %v762_v35 = vadd.bf16 %v746_v7, %v647_v26 }
 0x1c2   : > { %1457 = vtanh.bf16 %v750_v28 }
 0x1c3   : > { %1459 = vtanh.bf16 %v752_v29 }
 0x1c4   : > { %1461 = vtanh.bf16 %v754_v30 }
 0x1c5   : > { %1463 = vtanh.bf16 %v756_v31 }
 0x1c6   : > { %1465 = vtanh.bf16 %v758_v33 }
 0x1c7   : > { %v1440_v36 = vpop.eup %1439  ;;  %1467 = vtanh.bf16 %v760_v34 }
 0x1c8   : > { %v1442_v37 = vpop.eup %1441  ;;  %v779_v38 = vunpack.c.l.bf16 %v1440_v36  ;;  %v780_v39 = vunpack.c.h.bf16 %v1440_v36  ;;  %1469 = vtanh.bf16 %v762_v35 }
 0x1c9   : > { %v1444_v40 = vpop.eup %1443  ;;  %v783_v41 = vunpack.c.l.bf16 %v1442_v37  ;;  %v784_v42 = vunpack.c.h.bf16 %v1442_v37 }
 0x1ca   : > { %v1446_v44 = vpop.eup %1445  ;;  %v787_v45 = vunpack.c.l.bf16 %v1444_v40  ;;  %v788_v46 = vunpack.c.h.bf16 %v1444_v40  ;;  %v832_v47 = vmul.f32 %v1728_v0, %v780_v39  ;;  %v831_v48 = vmul.f32 %v1732_v43, %v779_v38 }
 0x1cb   : > { %v1448_v49 = vpop.eup %1447  ;;  %v791_v50 = vunpack.c.l.bf16 %v1446_v44  ;;  %v792_v51 = vunpack.c.h.bf16 %v1446_v44  ;;  %v836_v52 = vmul.f32 %v1728_v0, %v784_v42  ;;  %v835_v53 = vmul.f32 %v1732_v43, %v783_v41 }
 0x1cc   : > { %v1738_v54 = vpop.eup %1449  ;;  %v795_v55 = vunpack.c.l.bf16 %v1448_v49  ;;  %v796_v56 = vunpack.c.h.bf16 %v1448_v49  ;;  %v840_v57 = vmul.f32 %v1728_v0, %v788_v46  ;;  %v839_v58 = vmul.f32 %v1732_v43, %v787_v45 }
 0x1cd   : > { %v1742_v59 = vpop.eup %1451  ;;  %v799_v60 = vunpack.c.l.bf16 %v1738_v54  ;;  %v844_v61 = vmul.f32 %v1728_v0, %v792_v51  ;;  %v843_v62 = vmul.f32 %v1732_v43, %v791_v50  ;;  %v863_v63 = vadd.f32 %v832_v47, %v831_v48 }
 0x1ce   : > { %v1747_v2 = vpop.eup %1453  ;;  %v803_v4 = vunpack.c.l.bf16 %v1742_v59  ;;  %v848_v5 = vmul.f32 %v1728_v0, %v796_v56  ;;  %v847_v6 = vmul.f32 %v1732_v43, %v795_v55  ;;  %v872_v7 = vadd.f32 %v836_v52, %v835_v53 }
 0x1cf   : > { %v1456_v8 = vpop.eup %1455  ;;  %v1753_v9 = vmul.f32 %v1732_v43, %v799_v60  ;;  %v881_v10 = vadd.f32 %v840_v57, %v839_v58  ;;  %v890_v11 = vadd.f32 %v844_v61, %v843_v62  ;;  %v800_v12 = vunpack.c.h.bf16 %v1738_v54 }
 0x1d0   : > { %v1458_v13 = vpop.eup %1457  ;;  %v1757_v15 = vmul.f32 %v1732_v43, %v803_v4  ;;  %v1759_v16 = vadd.f32 %v848_v5, %v847_v6  ;;  %v781_v17 = vunpack.c.l.bf16 %v1456_v8  ;;  %v782_v18 = vunpack.c.h.bf16 %v1456_v8 }
 0x1d1   : > { %v1460_v20 = vpop.eup %1459  ;;  %v785_v21 = vunpack.c.l.bf16 %v1458_v13  ;;  %v786_v22 = vunpack.c.h.bf16 %v1458_v13  ;;  %v804_v24 = vunpack.c.h.bf16 %v1742_v59  ;;  %v807_v25 = vunpack.c.l.bf16 %v1747_v2 }
 0x1d2   : > { %v1462_v26 = vpop.eup %1461  ;;  %v789_v27 = vunpack.c.l.bf16 %v1460_v20  ;;  %v790_v28 = vunpack.c.h.bf16 %v1460_v20  ;;  %v833_v29 = vmul.f32 %v1730_v3, %v781_v17  ;;  %v834_v30 = vmul.f32 %v829_v23, %v782_v18 }
 0x1d3   : > { %v1464_v31 = vpop.eup %1463  ;;  %v793_v32 = vunpack.c.l.bf16 %v1462_v26  ;;  %v794_v33 = vunpack.c.h.bf16 %v1462_v26  ;;  %v837_v34 = vmul.f32 %v1730_v3, %v785_v21  ;;  %v838_v35 = vmul.f32 %v829_v23, %v786_v22 }
 0x1d4   : > { %v1466_v36 = vpop.eup %1465  ;;  %v798_v37 = vunpack.c.h.bf16 %v1464_v31  ;;  %v841_v38 = vmul.f32 %v1730_v3, %v789_v27  ;;  %v864_v39 = vadd.f32 %v863_v63, %v833_v29  ;;  %v842_v40 = vmul.f32 %v829_v23, %v790_v28 }
 0x1d5   : > { %v1468_v41 = vpop.eup %1467  ;;  %v845_v42 = vmul.f32 %v1730_v3, %v793_v32  ;;  %v873_v44 = vadd.f32 %v872_v7, %v837_v34  ;;  %v846_v45 = vmul.f32 %v829_v23, %v794_v33  ;;  %v797_v46 = vunpack.c.l.bf16 %v1464_v31 }
 0x1d6   : > { %v1470_v47 = vpop.eup %1469  ;;  %v882_v48 = vadd.f32 %v881_v10, %v841_v38  ;;  %v850_v49 = vmul.f32 %v829_v23, %v798_v37  ;;  %v865_v50 = vadd.f32 %v864_v39, %v834_v30  ;;  %v801_v51 = vunpack.c.l.bf16 %v1466_v36 }
 0x1d7   : > { %v891_v52 = vadd.f32 %v890_v11, %v845_v42  ;;  %v874_v53 = vadd.f32 %v873_v44, %v838_v35  ;;  %v802_v54 = vunpack.c.h.bf16 %v1466_v36  ;;  %v805_v55 = vunpack.c.l.bf16 %v1468_v41 }
 0x1d8   : > { %v866_v56 = vrot.slane %v865_v50, 4  ;;  %v883_v57 = vadd.f32 %v882_v48, %v842_v40  ;;  %v806_v58 = vunpack.c.h.bf16 %v1468_v41  ;;  %v808_v59 = vunpack.c.h.bf16 %v1747_v2 }
 0x1d9   : > { %v875_v60 = vrot.slane %v874_v53, 4  ;;  %v892_v61 = vadd.f32 %v891_v52, %v846_v45  ;;  %v809_v62 = vunpack.c.l.bf16 %v1470_v47  ;;  %v810_v63 = vunpack.c.h.bf16 %v1470_v47  ;;  %v972_v47 = vpop.permute.xlu0 %971 }
 0x1da   : > { %v867_v4 = vadd.f32 %v866_v56, %v865_v50  ;;  %v884_v5 = vrot.slane %v883_v57, 4  ;;  %v849_v6 = vmul.f32 %v1730_v3, %v797_v46  ;;  %v852_v7 = vmul.f32 %v1728_v0, %v800_v12 }
 0x1db   : > { %v876_v8 = vadd.f32 %v875_v60, %v874_v53  ;;  %v853_v10 = vmul.f32 %v1730_v3, %v801_v51  ;;  %v854_v11 = vmul.f32 %v829_v23, %v802_v54  ;;  %v856_v13 = vmul.f32 %v1728_v0, %v804_v24 }
 0x1dc   : > { %v857_v17 = vmul.f32 %v1730_v3, %v805_v55  ;;  %v858_v2 = vmul.f32 %v829_v23, %v806_v58  ;;  %v859_v18 = vmul.f32 %v1732_v43, %v807_v25  ;;  %v860_v20 = vmul.f32 %v1728_v0, %v808_v59 }
 0x1dd   : > { %v861_v21 = vmul.f32 %v1730_v3, %v809_v62  ;;  %v862_v22 = vmul.f32 %v829_v23, %v810_v63  ;;  %v868_v26 = vrot.slane %v867_v4, 2  ;;  %v877_v27 = vrot.slane %v876_v8, 2 }
 0x1de   : > { %v885_v12 = vadd.f32 %v884_v5, %v883_v57  ;;  %v893_v28 = vrot.slane %v892_v61, 4  ;;  %v900_v29 = vadd.f32 %v1759_v16, %v849_v6  ;;  %v908_v30 = vadd.f32 %v852_v7, %v1753_v9 }
 0x1df   : > { %v869_v31 = vadd.f32 %v868_v26, %v867_v4  ;;  %v878_v24 = vadd.f32 %v877_v27, %v876_v8  ;;  %v917_v32 = vadd.f32 %v856_v13, %v1757_v15  ;;  %v926_v33 = vadd.f32 %v860_v20, %v859_v18 }
 0x1e0   : > { %v886_v34 = vrot.slane %v885_v12, 2  ;;  %v894_v43 = vadd.f32 %v893_v28, %v892_v61  ;;  %v901_v25 = vadd.f32 %v900_v29, %v850_v49  ;;  %v909_v0 = vadd.f32 %v908_v30, %v853_v10  ;;  %v1431_v30 = vld [vmem:[%s1698_s21 + $0x38] sm:$0xff]  }
 0x1e1   : > { %v870_v35 = vrot.slane %v869_v31, 1  ;;  %v879_v3 = vrot.slane %v878_v24, 1  ;;  %v918_v23 = vadd.f32 %v917_v32, %v857_v17  ;;  %v927_v36 = vadd.f32 %v926_v33, %v861_v21  ;;  %1351 = vmatpush3.bf16.msra.mxu1 %v1431_v30  ;;  %v1434_v32 = vld [vmem:[%s1698_s21 + $0x20] sm:$0xff]  }
 0x1e2   : > { %v887_v37 = vadd.f32 %v886_v34, %v885_v12  ;;  %v895_v38 = vrot.slane %v894_v43, 2  ;;  %v902_v39 = vrot.slane %v901_v25, 4  ;;  %v910_v40 = vadd.f32 %v909_v0, %v854_v11  ;;  %1352 = vmatprep.subr.bf16.mxu1 %v1567_v1  ;;  %v1435_v0 = vld [vmem:[%s1698_s21 + $0x18] sm:$0xff]  }
 0x1e3   : > { %v871_v16 = vadd.f32 %v870_v35, %v869_v31  ;;  %v880_v41 = vadd.f32 %v879_v3, %v878_v24  ;;  %v919_v9 = vadd.f32 %v918_v23, %v858_v2  ;;  %v928_v42 = vadd.f32 %v927_v36, %v862_v22  ;;  %v1432_v31 = vld [vmem:[%s1698_s21 + $0x30] sm:$0xff]   ;;  %v1433_v24 = vld [vmem:[%s1698_s21 + $0x28] sm:$0xff]   ;;  %v1438_v23 = vld [vmem:[%s1698_s21] sm:$0xff]  }
 0x1e4   : > { %v888_v44 = vrot.slane %v887_v37, 1  ;;  %v896_v45 = vadd.f32 %v895_v38, %v894_v43  ;;  %v903_v15 = vadd.f32 %v902_v39, %v901_v25  ;;  %v911_v46 = vrot.slane %v910_v40, 4  ;;  %v1436_v35 = vld [vmem:[%s1698_s21 + $0x10] sm:$0xff]   ;;  %v1437_v3 = vld [vmem:[%s1698_s21 + $0x8] sm:$0xff]  }
 0x1e5   : > { %v920_v48 = vrot.slane %v919_v9, 4  ;;  %v929_v49 = vrot.slane %v928_v42, 4  ;;  %v952_v50 = vsel %vm951_vm3, %v880_v41, %v871_v16  ;;  %v968_v55 = vand.u32 127, %v656_v14  ;;  %1353 = vmatpush3.bf16.msra.mxu1 %v1432_v31 }
 0x1e6   : > { %v889_v51 = vadd.f32 %v888_v44, %v887_v37  ;;  %v897_v52 = vrot.slane %v896_v45, 1  ;;  %v904_v53 = vrot.slane %v903_v15, 2  ;;  %v912_v54 = vadd.f32 %v911_v46, %v910_v40  ;;  %1354 = vmatprep.subr.bf16.mxu1 %v1567_v1 }
 0x1e7   : > { %v921_v56 = vadd.f32 %v920_v48, %v919_v9  ;;  %v930_v57 = vadd.f32 %v929_v49, %v928_v42  ;;  %v976_v58 = vrot.slane %v972_v47, %v1708_v19  ;;  %v1570_v20 = vmov -1000000.0  }
 0x1e8   : > { %v905_v59 = vadd.f32 %v904_v53, %v903_v15  ;;  %v913_v60 = vrot.slane %v912_v54, 2  ;;  %v954_v61 = vsel %vm953_vm4, %v889_v51, %v952_v50  ;;  %v898_v62 = vadd.f32 %v897_v52, %v896_v45 }
 0x1e9   : > { %v922_v63 = vrot.slane %v921_v56, 2  ;;  %v931_v4 = vrot.slane %v930_v57, 2  ;;  %vm977_vm7 = vcmp.lt.s32.totalorder %v968_v55, %v976_v58  ;;  %vm979_vm11 = vcmp.lt.s32.totalorder %v968_v55, 8  ;;  %1355 = vmatpush3.bf16.msra.mxu1 %v1433_v24 }
 0x1ea   : > { %v906_v5 = vrot.slane %v905_v59, 1  ;;  %v914_v6 = vadd.f32 %v913_v60, %v912_v54  ;;  %v956_v10 = vsel %vm955_vm5, %v898_v62, %v954_v61  ;;  %v978_v21 = vsel %vm977_vm7, 0.0, %v1570_v20  ;;  %1356 = vmatprep.subr.bf16.mxu1 %v1567_v1 }
 0x1eb   : > { %v923_v7 = vadd.f32 %v922_v63, %v921_v56  ;;  %v932_v8 = vadd.f32 %v931_v4, %v930_v57  ;;  %v980_v28 = vsel %vm979_vm11, %v978_v21, -1e+09 }
 0x1ec   : > { %v907_v11 = vadd.f32 %v906_v5, %v905_v59  ;;  %v915_v14 = vrot.slane %v914_v6, 1 }
 0x1ed   : > { %v924_v13 = vrot.slane %v923_v7, 1  ;;  %v933_v17 = vrot.slane %v932_v8, 1  ;;  %1357 = vmatpush3.bf16.msra.mxu1 %v1434_v32 }
 0x1ee   : > { %v916_v19 = vadd.f32 %v915_v14, %v914_v6  ;;  %v958_v2 = vsel %vm957_vm6, %v907_v11, %v956_v10  ;;  %1358 = vmatprep.subr.bf16.mxu1 %v1567_v1 }
 0x1ef   : > { %v925_v18 = vadd.f32 %v924_v13, %v923_v7  ;;  %v934_v22 = vadd.f32 %v933_v17, %v932_v8 }
 0x1f0   : > { %v960_v26 = vsel %vm959_vm8, %v916_v19, %v958_v2 }
 0x1f1   : > { %v962_v27 = vsel %vm961_vm9, %v925_v18, %v960_v26  ;;  %1359 = vmatpush3.bf16.msra.mxu1 %v1435_v0 }
 0x1f2   : > { %v964_v12 = vsel %vm963_vm10, %v934_v22, %v962_v27  ;;  %1360 = vmatprep.subr.bf16.mxu1 %v1567_v1 }
 0x1f3   : > { %v982_v29 = vadd.f32 %v980_v28, %v964_v12 }
 0x1f5   : > { %983 = vmax.xlane.f32.xlu0 %v982_v29  ;;  %1361 = vmatpush3.bf16.msra.mxu1 %v1436_v35 }
 0x1f6   : > { %1362 = vmatprep.subr.bf16.mxu1 %v1567_v1 }
 0x1f9   : > { %1363 = vmatpush3.bf16.msra.mxu1 %v1437_v3 }
 0x1fa   : > { %1364 = vmatprep.subr.bf16.mxu1 %v1567_v1 }
 0x1fd   : > { %1365 = vmatpush3.bf16.msra.mxu1 %v1438_v23 }
 0x27e   : > { %v984_v33 = vpop.xlane.xlu0 %983 }
 0x27f   : > { %v985_v34 = vsub.f32 %v982_v29, %v984_v33 }
 0x281   : > { %v986_v43 = vmul.f32 1.442695, %v985_v34 }
 0x283   : > { %1471 = vpow2.f32 %v986_v43 }
 0x290   : > { %v1472_v25 = vpop.eup %1471 }
 0x291   : > { %988 = vadd.xlane.f32.xlu0 %v1472_v25 }
 0x31a   : > { %v989_v36 = vpop.xlane.xlu0 %988 }
 0x31b   : > { %1473 = vrcp.f32 %v989_v36 }
 0x328   : > { %v1474_v37 = vpop.eup %1473 }
 0x329   : > { %v992_v38 = vmul.f32 %v1474_v37, %v1472_v25 }
 0x32b   : > { %v993_v39 = vpack.c.bf16 %v992_v38, %v992_v38 }
 0x32d   : > { %1367 = vmatmul.mubr.bf16.vlgmr.msra.gmra.mxu1 %v993_v39  ;;  %994 = vst [vmem:[%s348_s24] sm:$0xf] %v993_v39 }
 0x32e   : > { %1488 = shalt.err (!%p1485_p3)
}
 0x32f   : > { %s1489_s22 = scalar_lea.hbm %s1130_s12, 64  ;;  %s1493_s21 = scalar_lea.hbm %s1873_s8, 128 }
 0x330   : > { %p1490_p4 = scmp.ne.s32.totalorder %s1130_s12, %s1489_s22  ;;  %p1494_p9 = scmp.lt.s32.totalorder %s1130_s12, %s1873_s8 }
 0x331   : > { %p1495_p10 = scmp.lt.s32.totalorder %s1493_s21, %s1489_s22 }
 0x332   : > { %p1491_p7 = pnand %p1490_p4, %p1656_p5 }
 0x333   : > { %p1496_p11 = por %p1495_p10, %p1494_p9 }
 0x334   : > { %p1492_p8 = pneg %p1491_p7 }
 0x336   : > { %p1497_p12 = pnand %p1496_p11, %p1492_p8 }
 0x338   : > { %1500 = shalt.err (!%p1497_p12)
}
 0x339   : > { %1371 = dma.vmem_to_hbm [thread:$0]  (%p1656_p5), %s1133_s26, 64, %s1130_s12, %s1106_s13  }
 0x33a   : > { %s1260_s17 = sshll.u32 %s1798_s23, 3  ;;  %s1297_s20 = sshll.u32 %s1639_s9, 7 }
 0x33b   : > { %s341_s18 = scalar_lea.vmem [#allocation3], %s1260_s17  ;;  %s1825_s22 = scalar_lea.hbm %s1872_s7, %s1297_s20 }
 0x33c   : > { %s1119_s19 = sshll.u32 %s341_s18, 4  ;;  %s1101_s25 = scalar_lea.sflag [#allocation4], %s1798_s23  ;;  %s1820_s19 = int_to_ptr.vmem [resolvable:$true] %s1119_s19 }
 0x33d   : > { %s1501_s21 = scalar_lea.vmem %s1820_s19, 128  ;;  %s1572_s9 = smov [#allocation3]  }
 0x33e   : > { %p1502_p13 = scmp.ne.s32.totalorder %s1820_s19, %s1501_s21  ;;  %s1505_s26 = sshll.u32 %s1572_s9, 4  ;;  %s1506_s26 = int_to_ptr.vmem [resolvable:$false] %s1505_s26 }
 0x33f   : > { %s1507_s12 = scalar_lea.vmem %s1506_s26, 256  ;;  %p1508_p2 = scmp.lt.s32.totalorder %s1820_s19, %s1506_s26 }
 0x340   : > { %p1503_p0 = pnand %p1502_p13, %p1656_p5  ;;  %p1509_p3 = scmp.lt.s32.totalorder %s1507_s12, %s1501_s21 }
 0x342   : > { %p1504_p1 = pneg %p1503_p0  ;;  %p1510_p4 = por %p1509_p3, %p1508_p2 }
 0x344   : > { %p1511_p7 = pnand %p1510_p4, %p1504_p1 }
 0x3ed   : > { %v1093_v1 = vpop.f32.mrf.mxu1 }
 0x3ee   : > { %1099 = vst [vmem:[%s341_s18] sm:$0xff] %v1093_v1 }
 0x3ef   : > { %v1368_v40 = vpop.f32.mrf.mxu1 }
 0x3f0   : > { %1514 = shalt.err (!%p1511_p7)
}
 0x3f1   : > { %s1515_s13 = scalar_lea.hbm %s1825_s22, 128  ;;  %s1519_s17 = scalar_lea.hbm %s1872_s7, 256 }
 0x3f2   : > { %p1516_p8 = scmp.ne.s32.totalorder %s1825_s22, %s1515_s13  ;;  %p1520_p11 = scmp.lt.s32.totalorder %s1825_s22, %s1872_s7 }
 0x3f3   : > { %p1521_p12 = scmp.lt.s32.totalorder %s1519_s17, %s1515_s13 }
 0x3f4   : > { %p1517_p9 = pnand %p1516_p8, %p1656_p5 }
 0x3f5   : > { %p1522_p13 = por %p1521_p12, %p1520_p11 }
 0x3f6   : > { %p1518_p10 = pneg %p1517_p9 }
 0x3f8   : > { %p1523_p0 = pnand %p1522_p13, %p1518_p10 }
 0x3fa   : > { %1526 = shalt.err (!%p1523_p0)
}
 0x3fb   : > { %1370 = dma.vmem_to_hbm [thread:$0]  (%p1656_p5), %s1820_s19, 128, %s1825_s22, %s1101_s25   ;;  %v1096_v16 = vpop.f32.mrf.mxu1 }
 0x3fd   : > { %v1369_v41 = vpop.f32.mrf.mxu1 }
 0x3fe PF: > { %p1381_p1 = scmp.ge.s32.totalorder %s1565_s30, 2  ;;  %s1144_s24 = sand.u32 1, %s1553_s27  }
 0x3ff   : > { %s1145_s0 = scalar_lea.sflag [#allocation4], %s1144_s24 }
 0x400   : > { %p1375_p2 = pnand %p1381_p1, %p1660_p6 }
 0x402   : > { %p1376_p3 = pneg %p1375_p2 }
 0x404   : > { %1544 = dma.done.wait (%p1376_p3), %s1145_s0, 128  }
 0x405   : > { %1546 = vsyncadd (%p1376_p3), %s1145_s0, 4294967168  ;;  %s1154_s21 = scalar_lea.sflag [#allocation6], %s1144_s24 }
 0x406   : > { %1548 = dma.done.wait (%p1376_p3), %s1154_s21, 64  }
 0x407   : > { %1550 = vsyncadd (%p1376_p3), %s1154_s21, 4294967232  ;;  %p22_p5 = scmp.ge.s32.totalorder %s1643_s11, 4   ;;  %s1878_s27 = smov %s1557_s28 }
 0x408   : > { %s1879_s28 = smov %s1561_s29  ;;  %s1880_s29 = smov %s1654_s14 }
 0x409   : > { %s1881_s30 = smov %s1643_s11  ;;  %24 = sbr.rel (!%p22_p5) target bundleno = 7 (0x7), region = 109 }
 0x40e   :  { %1159 = vsyncpa [#allocation4], 1 }
 0x40f   :  { %1161 = vsyncpa [#allocation4 + $0x1], 1 }
 0x410   :  { %1162 = vsyncpa [#allocation6], 1 }
 0x411   :  { %1164 = vsyncpa [#allocation6 + $0x1], 1 }

</bundles_post_ra>
